<compile_context>
chip_gen: v5e
topology: v5e:2x2
jax: 0.10.0
libtpu: 0.0.40
codegen_flags: <defaults>
</compile_context>

<pallas_src>
import numpy as np
import jax
import jax.numpy as jnp
from jax.experimental import pallas as pl
from jax.experimental.pallas import tpu as pltpu

# ----- config (mirrors criterion.__init__, deterministic, no checkpoint) -----
NUM_CLASSES       = 8
IGNORE_LABEL      = 0          # config['dataset_params']['ignore_label']
LABEL_SMOOTHING   = 0.2
LAMBDA_LOVASZ     = 1.0        # config['train_params']['lambda_lovasz']
SEG_NUM_PER_CLASS = np.array([100., 50., 25., 10., 200., 80., 40., 5.])


def _make_seg_labelweights():
    w = SEG_NUM_PER_CLASS / np.sum(SEG_NUM_PER_CLASS).astype(float)
    return (1.0 / (w + 0.02)).astype(np.float32)          # shape (C,)


# ---------------------------------------------------------------------------
# Kernel A: fused log-softmax / softmax, packed int32 Lovasz sort keys, and
# per-class partial sums for the weighted + label-smoothed CE.
# Layout: (C, TN) with C on sublanes, points on lanes (lane-dense stores).
# ---------------------------------------------------------------------------
def ce_key_kernel(logits_ref, labels_ref, keys_ref, part_ref):
    logits = logits_ref[...]                              # (C, TN) f32
    labels = labels_ref[...]                              # (1, TN) int32 (lane-dense)
    c, tn = logits.shape

    class_ids = jax.lax.broadcasted_iota(jnp.int32, (c, tn), 0)
    is_class = (labels == class_ids)                      # (C, TN) bool
    is_valid = (labels != IGNORE_LABEL)                   # (1, TN) bool
    fg_bool = jnp.logical_and(is_class, is_valid)         # (C, TN) bool
    fg = fg_bool.astype(jnp.float32)
    valid = is_valid.astype(jnp.float32)                  # (1, TN)

    # numerically stable log-softmax / softmax along the class (sublane) axis;
    # a single exact reciprocal per point instead of C divides (EUP relief).
    m = jnp.max(logits, axis=0, keepdims=True)            # (1, TN)
    z = logits - m
    ez = jnp.exp(z)
    se = jnp.sum(ez, axis=0, keepdims=True)               # (1, TN)
    inv_se = 1.0 / se
    neg_logp = jnp.log(se) - z                            # -log p
    probs = ez * inv_se

    masked_nlp = valid * neg_logp                         # (C, TN)
    # per-class partial sums (class weights are applied in the wrapper):
    a_part = jnp.sum(fg * neg_logp, axis=1, keepdims=True)       # Σ v*1[y=c]*(-logp_c)
    b_part = jnp.sum(masked_nlp, axis=1, keepdims=True)          # Σ v*(-logp_c)
    g_part = jnp.sum(fg, axis=1, keepdims=True)                  # valid fg count per class

    # packed, sort-ready int32 key:
    #   err >= 0  -> bitcast is order-preserving; clear the LSB and pack fg
    #   into it (<= 1 ulp perturbation); invert all bits so that ASCENDING
    #   lax.sort gives DESCENDING err.  Ignored/padded lanes get err=0, fg=0
    #   -> key = -1 (the maximum) -> they sort to the tail and contribute 0.
    err = valid * jnp.abs(fg - probs)                     # (C, TN), >= 0
    bits = pltpu.bitcast(err, jnp.int32)
    fgbit = fg_bool.astype(jnp.int32)
    keys_ref[...] = ((bits & (-2)) | fgbit) ^ (-1)

    # per-tile partials, lane-broadcast: rows [0,C)=A, [C,2C)=B, [2C,3C)=G
    part_ref[0, 0:c, :] = jnp.broadcast_to(a_part, (c, 128))
    part_ref[0, c:2 * c, :] = jnp.broadcast_to(b_part, (c, 128))
    part_ref[0, 2 * c:3 * c, :] = jnp.broadcast_to(g_part, (c, 128))


# ---------------------------------------------------------------------------
# Kernel B: Lovasz-softmax on (per-class) descending-sorted packed keys.
# Running cumsum along the sorted (lane) axis with per-class carries; no
# N x N matrices anywhere -> O(N) compute and memory.
# ---------------------------------------------------------------------------
def lovasz_kernel(gts_ref, keys_ref, out_ref, cum_ref, prev_ref):
    t = pl.program_id(0)
    keys = keys_ref[...]                # (C, TN) int32 packed keys, sorted per class
    gts = gts_ref[...]                  # (C, 1)  total valid fg count per class
    c, tn = keys.shape

    @pl.when(t == 0)
    def _():
        out_ref[...] = jnp.zeros_like(out_ref)
        cum_ref[...] = jnp.zeros_like(cum_ref)
        prev_ref[...] = jnp.zeros_like(prev_ref)   # prev jaccard 0 => grad[0] = jaccard[0]

    # unpack: invert bits back, fg from LSB, err from the remaining bits
    raw = keys ^ (-1)
    fg = (raw & 1).astype(jnp.float32)                            # (C, TN)
    err = pltpu.bitcast(raw & (-2), jnp.float32)                  # (C, TN), >= 0

    carry_cum = cum_ref[:, 0:1]         # (C,1) Σ fg over previous tiles
    prev_jac = prev_ref[:, 0:1]         # (C,1) last jaccard of previous tile

    # inclusive running cumsum of fg along lanes: log-step roll (XLU) + mask,
    # no full-tile concat/slice copies on the load/store path.
    lane = jax.lax.broadcasted_iota(jnp.int32, (c, tn), 1)
    x = fg
    k = 1
    while k < tn:
        rolled = pltpu.roll(x, shift=k, axis=1)                   # x[i-k] (circular)
        x = x + jnp.where(lane >= k, rolled, 0.0)                 # mask wrap-around
        k *= 2
    cum_fg = carry_cum + x                                        # (C, TN)

    pos = (lane + (t * tn + 1)).astype(jnp.float32)               # global 1-based index
    cum_nfg = pos - cum_fg                                        # cumsum of (1 - fg)
    intersection = gts - cum_fg
    union = gts + cum_nfg                                         # always >= 1
    jaccard = 1.0 - intersection / union                          # (C, TN)

    # first-order difference, carried across tile boundaries
    jac_prev = jnp.where(lane >= 1, pltpu.roll(jaccard, shift=1, axis=1), prev_jac)
    grad = jaccard - jac_prev
    part = jnp.sum(err * grad, axis=1, keepdims=True)             # (C, 1)
    out_ref[...] = out_ref[...] + jnp.broadcast_to(part, out_ref.shape)

    # update carries for the next tile
    cum_ref[:, 0:1] = cum_fg[:, tn - 1:tn]
    prev_ref[:, 0:1] = jaccard[:, tn - 1:tn]


# ---------------------------------------------------------------------------
# Wrapper == criterion.forward({'logits': logits, 'labels': labels})
# ---------------------------------------------------------------------------
def criterion_forward(logits, labels, *, tile_n=16384):
    n, c = logits.shape
    eps = LABEL_SMOOTHING
    w = jnp.asarray(_make_seg_labelweights())                      # (C,)

    # one-time layout flip: classes -> sublanes, points -> lanes
    logits_t = logits.astype(jnp.float32).T                        # (C, N)
    labels_r = labels.astype(jnp.int32).reshape(1, n)              # (1, N)

    # lane-aligned point tile; padded tail uses the ignore label -> contributes 0
    tile_n = max(128, min(int(tile_n), ((n + 127) // 128) * 128))
    tile_n = ((tile_n + 127) // 128) * 128
    n_pad = ((n + tile_n - 1) // tile_n) * tile_n
    if n_pad != n:
        logits_t = jnp.pad(logits_t, ((0, 0), (0, n_pad - n)))
        labels_r = jnp.pad(labels_r, ((0, 0), (0, n_pad - n)),
                           constant_values=IGNORE_LABEL)
    num_tiles = n_pad // tile_n

    # ---- kernel A: tiled + parallel over points (megacore sharding) ---------
    keys, parts = pl.pallas_call(
        ce_key_kernel,
        grid=(num_tiles,),
        in_specs=[
            pl.BlockSpec((c, tile_n), lambda i: (0, i)),
            pl.BlockSpec((1, tile_n), lambda i: (0, i)),
        ],
        out_specs=(
            pl.BlockSpec((c, tile_n), lambda i: (0, i)),
            pl.BlockSpec((1, 3 * c, 128), lambda i: (i, 0, 0)),
        ),
        out_shape=(
            jax.ShapeDtypeStruct((c, n_pad), jnp.int32),
            jax.ShapeDtypeStruct((num_tiles, 3 * c, 128), jnp.float32),
        ),
        compiler_params=pltpu.CompilerParams(
            dimension_semantics=("parallel",),
            vmem_limit_bytes=32 * 1024 * 1024),
    )(logits_t, labels_r)

    # fold the per-tile partials with the class weights (tiny JAX glue)
    sums = jnp.sum(parts[:, :, 0], axis=0)                         # (3C,)
    a_sum, b_sum, g_sum = sums[0:c], sums[c:2 * c], sums[2 * c:3 * c]
    nll_num = jnp.sum(w * a_sum)        # Σ_valid w[y] * (-log p[y])
    nll_den = jnp.sum(w * g_sum)        # Σ_valid w[y]
    smooth_num = jnp.sum(w * b_sum)     # Σ_valid Σ_c w[c] * (-log p[c])
    denom = jnp.where(nll_den > 0, nll_den, 1.0)                   # all-ignored guard
    ce = ((1.0 - eps) * nll_num + (eps / c) * smooth_num) / denom

    # per-class descending sort of the packed int32 keys: a single ascending
    # lax.sort on the bit-inverted keys (no negation passes, no fg payload).
    # TODO(synk): the data-dependent sort has no clean in-kernel Pallas TPU
    # primitive; it stays in XLA on the (C, N) int32 key array.
    keys_sorted = jax.lax.sort(keys, dimension=1)

    # ---- kernel B: Lovasz, tiled with running-cumsum / jaccard carries ------
    gts = g_sum.reshape(c, 1)
    per_class = pl.pallas_call(
        lovasz_kernel,
        grid=(num_tiles,),
        in_specs=[
            pl.BlockSpec((c, 1), lambda i: (0, 0)),
            pl.BlockSpec((c, tile_n), lambda i: (0, i)),
        ],
        out_specs=pl.BlockSpec((c, 128), lambda i: (0, 0)),
        out_shape=jax.ShapeDtypeStruct((c, 128), jnp.float32),
        scratch_shapes=[
            pltpu.VMEM((c, 128), jnp.float32),   # running Σ fg carry
            pltpu.VMEM((c, 128), jnp.float32),   # previous-tile last jaccard
        ],
        compiler_params=pltpu.CompilerParams(
            dimension_semantics=("arbitrary",),  # sequential: carries + accumulator
            vmem_limit_bytes=32 * 1024 * 1024),
    )(gts, keys_sorted)

    per_class_loss = per_class[:, 0]                               # (C,)
    present = (g_sum > 0).astype(jnp.float32)
    lovasz = jnp.sum(per_class_loss * present) / jnp.maximum(jnp.sum(present), 1.0)

    return ce + LAMBDA_LOVASZ * lovasz


if __name__ == "__main__":
    key = jax.random.PRNGKey(0)
    k1, k2 = jax.random.split(key)
    N, C = 256, NUM_CLASSES
    logits = jax.random.normal(k1, (N, C), dtype=jnp.float32)      # data_dict['logits']
    labels = jax.random.randint(k2, (N,), 0, C, dtype=jnp.int32)   # data_dict['labels'] (0 == ignore)

    loss = jax.jit(criterion_forward)(logits, labels)
    loss = jax.block_until_ready(loss)
    assert bool(jnp.isfinite(loss)), "loss is not finite"
    print("KERNEL_OK")
</pallas_src>

<mosaic_0001>
module attributes {stable_mosaic.version = 11 : i64} {
  func.func @ce_key_kernel(%arg0: i32, %arg1: memref<8x256xf32, #tpu.memory_space<vmem>>, %arg2: memref<1x256xi32, #tpu.memory_space<vmem>>, %arg3: memref<8x256xi32, #tpu.memory_space<vmem>>, %arg4: memref<1x24x128xf32, #tpu.memory_space<vmem>>) attributes {dimension_semantics = [#tpu.dimension_semantics<parallel>], iteration_bounds = array<i64: 1>, scalar_prefetch = 0 : i64, scratch_operands = 0 : i64, tpu.core_type = #tpu.core_type<tc>, window_params = [{transform_indices = @transform_0, window_bounds = array<i64: 8, 256>}, {transform_indices = @transform_1, window_bounds = array<i64: 1, 256>}, {transform_indices = @transform_2, window_bounds = array<i64: 8, 256>}, {transform_indices = @transform_3, window_bounds = array<i64: 1, 24, 128>}]} {
    %c0 = arith.constant 0 : index
    %c0_0 = arith.constant 0 : index
    %0 = vector.load %arg1[%c0, %c0_0] : memref<8x256xf32, #tpu.memory_space<vmem>>, vector<8x256xf32>
    %c0_1 = arith.constant 0 : index
    %c0_2 = arith.constant 0 : index
    %1 = vector.load %arg2[%c0_1, %c0_2] : memref<1x256xi32, #tpu.memory_space<vmem>>, vector<1x256xi32>
    %2 = tpu.iota {dimensions = array<i32: 0>} : vector<8x256xi32>
    %3 = vector.broadcast %1 : vector<1x256xi32> to vector<8x256xi32>
    %4 = arith.cmpi eq, %3, %2 : vector<8x256xi32>
    %c0_i32 = arith.constant 0 : i32
    %5 = vector.broadcast %c0_i32 : i32 to vector<1x256xi32>
    %6 = arith.cmpi ne, %1, %5 : vector<1x256xi32>
    %7 = vector.broadcast %6 : vector<1x256xi1> to vector<8x256xi1>
    %8 = arith.andi %4, %7 : vector<8x256xi1>
    %9 = arith.extui %8 : vector<8x256xi1> to vector<8x256xi32>
    %10 = arith.sitofp %9 : vector<8x256xi32> to vector<8x256xf32>
    %11 = arith.extui %6 : vector<1x256xi1> to vector<1x256xi32>
    %12 = arith.sitofp %11 : vector<1x256xi32> to vector<1x256xf32>
    %cst = arith.constant dense<0xFF800000> : vector<256xf32>
    %13 = vector.multi_reduction <maximumf>, %0, %cst [0] : vector<8x256xf32> to vector<256xf32>
    %14 = vector.shape_cast %13 : vector<256xf32> to vector<1x256xf32>
    %15 = vector.broadcast %14 : vector<1x256xf32> to vector<8x256xf32>
    %16 = arith.subf %0, %15 : vector<8x256xf32>
    %17 = math.exp %16 : vector<8x256xf32>
    %cst_3 = arith.constant dense<0.000000e+00> : vector<256xf32>
    %18 = vector.multi_reduction <add>, %17, %cst_3 [0] : vector<8x256xf32> to vector<256xf32>
    %19 = vector.shape_cast %18 : vector<256xf32> to vector<1x256xf32>
    %cst_4 = arith.constant 1.000000e+00 : f32
    %20 = vector.broadcast %cst_4 : f32 to vector<1x256xf32>
    %21 = arith.divf %20, %19 : vector<1x256xf32>
    %22 = math.log %19 : vector<1x256xf32>
    %23 = vector.broadcast %22 : vector<1x256xf32> to vector<8x256xf32>
    %24 = arith.subf %23, %16 : vector<8x256xf32>
    %25 = vector.broadcast %21 : vector<1x256xf32> to vector<8x256xf32>
    %26 = arith.mulf %17, %25 : vector<8x256xf32>
    %27 = vector.broadcast %12 : vector<1x256xf32> to vector<8x256xf32>
    %28 = arith.mulf %27, %24 : vector<8x256xf32>
    %29 = arith.mulf %10, %24 : vector<8x256xf32>
    %cst_5 = arith.constant dense<0.000000e+00> : vector<8xf32>
    %30 = vector.multi_reduction <add>, %29, %cst_5 [1] : vector<8x256xf32> to vector<8xf32>
    %31 = vector.shape_cast %30 : vector<8xf32> to vector<8x1xf32>
    %cst_6 = arith.constant dense<0.000000e+00> : vector<8xf32>
    %32 = vector.multi_reduction <add>, %28, %cst_6 [1] : vector<8x256xf32> to vector<8xf32>
    %33 = vector.shape_cast %32 : vector<8xf32> to vector<8x1xf32>
    %cst_7 = arith.constant dense<0.000000e+00> : vector<8xf32>
    %34 = vector.multi_reduction <add>, %10, %cst_7 [1] : vector<8x256xf32> to vector<8xf32>
    %35 = vector.shape_cast %34 : vector<8xf32> to vector<8x1xf32>
    %36 = arith.subf %10, %26 : vector<8x256xf32>
    %37 = math.absf %36 : vector<8x256xf32>
    %38 = vector.broadcast %12 : vector<1x256xf32> to vector<8x256xf32>
    %39 = arith.mulf %38, %37 : vector<8x256xf32>
    %40 = tpu.bitcast %39 : vector<8x256xf32> -> vector<8x256xi32>
    %41 = arith.extui %8 : vector<8x256xi1> to vector<8x256xi32>
    %c-2_i32 = arith.constant -2 : i32
    %42 = vector.broadcast %c-2_i32 : i32 to vector<8x256xi32>
    %43 = arith.andi %40, %42 : vector<8x256xi32>
    %44 = arith.ori %43, %41 : vector<8x256xi32>
    %c-1_i32 = arith.constant -1 : i32
    %45 = vector.broadcast %c-1_i32 : i32 to vector<8x256xi32>
    %46 = arith.xori %44, %45 : vector<8x256xi32>
    %c0_8 = arith.constant 0 : index
    %c0_9 = arith.constant 0 : index
    %47 = vector.load %arg3[%c0_8, %c0_9] : memref<8x256xi32, #tpu.memory_space<vmem>>, vector<8x256xi32>
    tpu.vector_store %arg3[%c0_8, %c0_9], %46 {strides = array<i32>} : memref<8x256xi32, #tpu.memory_space<vmem>>, vector<8x256xi32>,
    %48 = vector.shape_cast %31 : vector<8x1xf32> to vector<8x1xf32>
    %49 = vector.broadcast %48 : vector<8x1xf32> to vector<8x128xf32>
    %c0_10 = arith.constant 0 : index
    %c0_11 = arith.constant 0 : index
    %c0_12 = arith.constant 0 : index
    %50 = vector.load %arg4[%c0_10, %c0_11, %c0_12] : memref<1x24x128xf32, #tpu.memory_space<vmem>>, vector<1x8x128xf32>
    %51 = vector.shape_cast %50 : vector<1x8x128xf32> to vector<8x128xf32>
    %52 = vector.shape_cast %49 : vector<8x128xf32> to vector<1x8x128xf32>
    tpu.vector_store %arg4[%c0_10, %c0_11, %c0_12], %52 {strides = array<i32>} : memref<1x24x128xf32, #tpu.memory_space<vmem>>, vector<1x8x128xf32>,
    %53 = vector.shape_cast %33 : vector<8x1xf32> to vector<8x1xf32>
    %54 = vector.broadcast %53 : vector<8x1xf32> to vector<8x128xf32>
    %c0_13 = arith.constant 0 : index
    %c8 = arith.constant 8 : index
    %c0_14 = arith.constant 0 : index
    %55 = vector.load %arg4[%c0_13, %c8, %c0_14] : memref<1x24x128xf32, #tpu.memory_space<vmem>>, vector<1x8x128xf32>
    %56 = vector.shape_cast %55 : vector<1x8x128xf32> to vector<8x128xf32>
    %57 = vector.shape_cast %54 : vector<8x128xf32> to vector<1x8x128xf32>
    tpu.vector_store %arg4[%c0_13, %c8, %c0_14], %57 {strides = array<i32>} : memref<1x24x128xf32, #tpu.memory_space<vmem>>, vector<1x8x128xf32>,
    %58 = vector.shape_cast %35 : vector<8x1xf32> to vector<8x1xf32>
    %59 = vector.broadcast %58 : vector<8x1xf32> to vector<8x128xf32>
    %c0_15 = arith.constant 0 : index
    %c16 = arith.constant 16 : index
    %c0_16 = arith.constant 0 : index
    %60 = vector.load %arg4[%c0_15, %c16, %c0_16] : memref<1x24x128xf32, #tpu.memory_space<vmem>>, vector<1x8x128xf32>
    %61 = vector.shape_cast %60 : vector<1x8x128xf32> to vector<8x128xf32>
    %62 = vector.shape_cast %59 : vector<8x128xf32> to vector<1x8x128xf32>
    tpu.vector_store %arg4[%c0_15, %c16, %c0_16], %62 {strides = array<i32>} : memref<1x24x128xf32, #tpu.memory_space<vmem>>, vector<1x8x128xf32>,
    return
  }
  func.func @transform_0(%arg0: i32) -> (i32, i32) {
    %c0_i32 = arith.constant 0 : i32
    %c0_i32_0 = arith.constant 0 : i32
    return %c0_i32, %arg0 : i32, i32
  }
  func.func @transform_1(%arg0: i32) -> (i32, i32) {
    %c0_i32 = arith.constant 0 : i32
    %c0_i32_0 = arith.constant 0 : i32
    return %c0_i32, %arg0 : i32, i32
  }
  func.func @transform_2(%arg0: i32) -> (i32, i32) {
    %c0_i32 = arith.constant 0 : i32
    %c0_i32_0 = arith.constant 0 : i32
    return %c0_i32, %arg0 : i32, i32
  }
  func.func @transform_3(%arg0: i32) -> (i32, i32, i32) {
    %c0_i32 = arith.constant 0 : i32
    %c0_i32_0 = arith.constant 0 : i32
    %c0_i32_1 = arith.constant 0 : i32
    return %arg0, %c0_i32, %c0_i32_0 : i32, i32, i32
  }
}

module attributes {stable_mosaic.version = 11 : i64} {
  func.func @lovasz_kernel(%arg0: i32, %arg1: memref<8x1xf32, #tpu.memory_space<vmem>>, %arg2: memref<8x256xi32, #tpu.memory_space<vmem>>, %arg3: memref<8x128xf32, #tpu.memory_space<vmem>>, %arg4: memref<8x128xf32, #tpu.memory_space<vmem>>, %arg5: memref<8x128xf32, #tpu.memory_space<vmem>>) attributes {dimension_semantics = [#tpu.dimension_semantics<arbitrary>], iteration_bounds = array<i64: 1>, scalar_prefetch = 0 : i64, scratch_operands = 2 : i64, tpu.core_type = #tpu.core_type<tc>, window_params = [{pipeline_mode = #tpu.pipeline_mode<synchronous>, transform_indices = @transform_0, window_bounds = array<i64: 8, 1>}, {transform_indices = @transform_1, window_bounds = array<i64: 8, 256>}, {pipeline_mode = #tpu.pipeline_mode<synchronous>, transform_indices = @transform_2, window_bounds = array<i64: 8, 128>}]} {
    %c0 = arith.constant 0 : index
    %c0_0 = arith.constant 0 : index
    %0 = vector.load %arg2[%c0, %c0_0] : memref<8x256xi32, #tpu.memory_space<vmem>>, vector<8x256xi32>
    %c0_1 = arith.constant 0 : index
    %c0_2 = arith.constant 0 : index
    %1 = vector.load %arg1[%c0_1, %c0_2] : memref<8x1xf32, #tpu.memory_space<vmem>>, vector<8x1xf32>
    %c0_i32 = arith.constant 0 : i32
    %2 = arith.cmpi eq, %arg0, %c0_i32 : i32
    %3 = arith.extui %2 : i1 to i32
    %c0_i32_3 = arith.constant 0 : i32
    %4 = arith.cmpi ne, %3, %c0_i32_3 : i32
    scf.if %4 {
      %cst_37 = arith.constant 0.000000e+00 : f32
      %98 = vector.broadcast %cst_37 : f32 to vector<8x128xf32>
      %c0_38 = arith.constant 0 : index
      %c0_39 = arith.constant 0 : index
      %99 = vector.load %arg3[%c0_38, %c0_39] : memref<8x128xf32, #tpu.memory_space<vmem>>, vector<8x128xf32>
      tpu.vector_store %arg3[%c0_38, %c0_39], %98 {strides = array<i32>} : memref<8x128xf32, #tpu.memory_space<vmem>>, vector<8x128xf32>,
      %cst_40 = arith.constant 0.000000e+00 : f32
      %100 = vector.broadcast %cst_40 : f32 to vector<8x128xf32>
      %c0_41 = arith.constant 0 : index
      %c0_42 = arith.constant 0 : index
      %101 = vector.load %arg4[%c0_41, %c0_42] : memref<8x128xf32, #tpu.memory_space<vmem>>, vector<8x128xf32>
      tpu.vector_store %arg4[%c0_41, %c0_42], %100 {strides = array<i32>} : memref<8x128xf32, #tpu.memory_space<vmem>>, vector<8x128xf32>,
      %cst_43 = arith.constant 0.000000e+00 : f32
      %102 = vector.broadcast %cst_43 : f32 to vector<8x128xf32>
      %c0_44 = arith.constant 0 : index
      %c0_45 = arith.constant 0 : index
      %103 = vector.load %arg5[%c0_44, %c0_45] : memref<8x128xf32, #tpu.memory_space<vmem>>, vector<8x128xf32>
      tpu.vector_store %arg5[%c0_44, %c0_45], %102 {strides = array<i32>} : memref<8x128xf32, #tpu.memory_space<vmem>>, vector<8x128xf32>,
    } else {
    }
    %c-1_i32 = arith.constant -1 : i32
    %5 = vector.broadcast %c-1_i32 : i32 to vector<8x256xi32>
    %6 = arith.xori %0, %5 : vector<8x256xi32>
    %c1_i32 = arith.constant 1 : i32
    %7 = vector.broadcast %c1_i32 : i32 to vector<8x256xi32>
    %8 = arith.andi %6, %7 : vector<8x256xi32>
    %9 = arith.sitofp %8 : vector<8x256xi32> to vector<8x256xf32>
    %c-2_i32 = arith.constant -2 : i32
    %10 = vector.broadcast %c-2_i32 : i32 to vector<8x256xi32>
    %11 = arith.andi %6, %10 : vector<8x256xi32>
    %12 = tpu.bitcast %11 : vector<8x256xi32> -> vector<8x256xf32>
    %c0_4 = arith.constant 0 : index
    %c0_5 = arith.constant 0 : index
    %13 = vector.load %arg4[%c0_4, %c0_5] : memref<8x128xf32, #tpu.memory_space<vmem>>, vector<8x1xf32>
    %c0_6 = arith.constant 0 : index
    %c0_7 = arith.constant 0 : index
    %14 = vector.load %arg5[%c0_6, %c0_7] : memref<8x128xf32, #tpu.memory_space<vmem>>, vector<8x1xf32>
    %15 = tpu.iota {dimensions = array<i32: 1>} : vector<8x256xi32>
    %c1_i32_8 = arith.constant 1 : i32
    %16 = tpu.dynamic_rotate %9 by %c1_i32_8 dim 1 : vector<8x256xf32>, i32 -> vector<8x256xf32>
    %c1_i32_9 = arith.constant 1 : i32
    %17 = vector.broadcast %c1_i32_9 : i32 to vector<8x256xi32>
    %18 = arith.cmpi sge, %15, %17 : vector<8x256xi32>
    %cst = arith.constant 0.000000e+00 : f32
    %19 = vector.broadcast %cst : f32 to vector<8x256xf32>
    %20 = arith.select %18, %16, %19 : vector<8x256xi1>, vector<8x256xf32>
    %21 = arith.addf %9, %20 : vector<8x256xf32>
    %c2_i32 = arith.constant 2 : i32
    %22 = tpu.dynamic_rotate %21 by %c2_i32 dim 1 : vector<8x256xf32>, i32 -> vector<8x256xf32>
    %c2_i32_10 = arith.constant 2 : i32
    %23 = vector.broadcast %c2_i32_10 : i32 to vector<8x256xi32>
    %24 = arith.cmpi sge, %15, %23 : vector<8x256xi32>
    %cst_11 = arith.constant 0.000000e+00 : f32
    %25 = vector.broadcast %cst_11 : f32 to vector<8x256xf32>
    %26 = arith.select %24, %22, %25 : vector<8x256xi1>, vector<8x256xf32>
    %27 = arith.addf %21, %26 : vector<8x256xf32>
    %c4_i32 = arith.constant 4 : i32
    %28 = tpu.dynamic_rotate %27 by %c4_i32 dim 1 : vector<8x256xf32>, i32 -> vector<8x256xf32>
    %c4_i32_12 = arith.constant 4 : i32
    %29 = vector.broadcast %c4_i32_12 : i32 to vector<8x256xi32>
    %30 = arith.cmpi sge, %15, %29 : vector<8x256xi32>
    %cst_13 = arith.constant 0.000000e+00 : f32
    %31 = vector.broadcast %cst_13 : f32 to vector<8x256xf32>
    %32 = arith.select %30, %28, %31 : vector<8x256xi1>, vector<8x256xf32>
    %33 = arith.addf %27, %32 : vector<8x256xf32>
    %c8_i32 = arith.constant 8 : i32
    %34 = tpu.dynamic_rotate %33 by %c8_i32 dim 1 : vector<8x256xf32>, i32 -> vector<8x256xf32>
    %c8_i32_14 = arith.constant 8 : i32
    %35 = vector.broadcast %c8_i32_14 : i32 to vector<8x256xi32>
    %36 = arith.cmpi sge, %15, %35 : vector<8x256xi32>
    %cst_15 = arith.constant 0.000000e+00 : f32
    %37 = vector.broadcast %cst_15 : f32 to vector<8x256xf32>
    %38 = arith.select %36, %34, %37 : vector<8x256xi1>, vector<8x256xf32>
    %39 = arith.addf %33, %38 : vector<8x256xf32>
    %c16_i32 = arith.constant 16 : i32
    %40 = tpu.dynamic_rotate %39 by %c16_i32 dim 1 : vector<8x256xf32>, i32 -> vector<8x256xf32>
    %c16_i32_16 = arith.constant 16 : i32
    %41 = vector.broadcast %c16_i32_16 : i32 to vector<8x256xi32>
    %42 = arith.cmpi sge, %15, %41 : vector<8x256xi32>
    %cst_17 = arith.constant 0.000000e+00 : f32
    %43 = vector.broadcast %cst_17 : f32 to vector<8x256xf32>
    %44 = arith.select %42, %40, %43 : vector<8x256xi1>, vector<8x256xf32>
    %45 = arith.addf %39, %44 : vector<8x256xf32>
    %c32_i32 = arith.constant 32 : i32
    %46 = tpu.dynamic_rotate %45 by %c32_i32 dim 1 : vector<8x256xf32>, i32 -> vector<8x256xf32>
    %c32_i32_18 = arith.constant 32 : i32
    %47 = vector.broadcast %c32_i32_18 : i32 to vector<8x256xi32>
    %48 = arith.cmpi sge, %15, %47 : vector<8x256xi32>
    %cst_19 = arith.constant 0.000000e+00 : f32
    %49 = vector.broadcast %cst_19 : f32 to vector<8x256xf32>
    %50 = arith.select %48, %46, %49 : vector<8x256xi1>, vector<8x256xf32>
    %51 = arith.addf %45, %50 : vector<8x256xf32>
    %c64_i32 = arith.constant 64 : i32
    %52 = tpu.dynamic_rotate %51 by %c64_i32 dim 1 : vector<8x256xf32>, i32 -> vector<8x256xf32>
    %c64_i32_20 = arith.constant 64 : i32
    %53 = vector.broadcast %c64_i32_20 : i32 to vector<8x256xi32>
    %54 = arith.cmpi sge, %15, %53 : vector<8x256xi32>
    %cst_21 = arith.constant 0.000000e+00 : f32
    %55 = vector.broadcast %cst_21 : f32 to vector<8x256xf32>
    %56 = arith.select %54, %52, %55 : vector<8x256xi1>, vector<8x256xf32>
    %57 = arith.addf %51, %56 : vector<8x256xf32>
    %c128_i32 = arith.constant 128 : i32
    %58 = tpu.dynamic_rotate %57 by %c128_i32 dim 1 : vector<8x256xf32>, i32 -> vector<8x256xf32>
    %c128_i32_22 = arith.constant 128 : i32
    %59 = vector.broadcast %c128_i32_22 : i32 to vector<8x256xi32>
    %60 = arith.cmpi sge, %15, %59 : vector<8x256xi32>
    %cst_23 = arith.constant 0.000000e+00 : f32
    %61 = vector.broadcast %cst_23 : f32 to vector<8x256xf32>
    %62 = arith.select %60, %58, %61 : vector<8x256xi1>, vector<8x256xf32>
    %63 = arith.addf %57, %62 : vector<8x256xf32>
    %64 = vector.broadcast %13 : vector<8x1xf32> to vector<8x256xf32>
    %65 = arith.addf %64, %63 : vector<8x256xf32>
    %c256_i32 = arith.constant 256 : i32
    %66 = arith.muli %arg0, %c256_i32 : i32
    %c1_i32_24 = arith.constant 1 : i32
    %67 = arith.addi %66, %c1_i32_24 : i32
    %68 = vector.broadcast %67 : i32 to vector<8x256xi32>
    %69 = arith.addi %15, %68 : vector<8x256xi32>
    %70 = arith.sitofp %69 : vector<8x256xi32> to vector<8x256xf32>
    %71 = arith.subf %70, %65 : vector<8x256xf32>
    %72 = vector.broadcast %1 : vector<8x1xf32> to vector<8x256xf32>
    %73 = arith.subf %72, %65 : vector<8x256xf32>
    %74 = vector.broadcast %1 : vector<8x1xf32> to vector<8x256xf32>
    %75 = arith.addf %74, %71 : vector<8x256xf32>
    %76 = arith.divf %73, %75 : vector<8x256xf32>
    %cst_25 = arith.constant 1.000000e+00 : f32
    %77 = vector.broadcast %cst_25 : f32 to vector<8x256xf32>
    %78 = arith.subf %77, %76 : vector<8x256xf32>
    %c1_i32_26 = arith.constant 1 : i32
    %79 = vector.broadcast %c1_i32_26 : i32 to vector<8x256xi32>
    %80 = arith.cmpi sge, %15, %79 : vector<8x256xi32>
    %c1_i32_27 = arith.constant 1 : i32
    %81 = tpu.dynamic_rotate %78 by %c1_i32_27 dim 1 : vector<8x256xf32>, i32 -> vector<8x256xf32>
    %82 = vector.shape_cast %14 : vector<8x1xf32> to vector<8x1xf32>
    %83 = vector.broadcast %82 : vector<8x1xf32> to vector<8x256xf32>
    %84 = arith.select %80, %81, %83 : vector<8x256xi1>, vector<8x256xf32>
    %85 = arith.subf %78, %84 : vector<8x256xf32>
    %86 = arith.mulf %12, %85 : vector<8x256xf32>
    %cst_28 = arith.constant dense<0.000000e+00> : vector<8xf32>
    %87 = vector.multi_reduction <add>, %86, %cst_28 [1] : vector<8x256xf32> to vector<8xf32>
    %88 = vector.shape_cast %87 : vector<8xf32> to vector<8x1xf32>
    %c0_29 = arith.constant 0 : index
    %c0_30 = arith.constant 0 : index
    %89 = vector.load %arg3[%c0_29, %c0_30] : memref<8x128xf32, #tpu.memory_space<vmem>>, vector<8x128xf32>
    %90 = vector.shape_cast %88 : vector<8x1xf32> to vector<8x1xf32>
    %91 = vector.broadcast %90 : vector<8x1xf32> to vector<8x128xf32>
    %92 = arith.addf %89, %91 : vector<8x128xf32>
    %c0_31 = arith.constant 0 : index
    %c0_32 = arith.constant 0 : index
    %93 = vector.load %arg3[%c0_31, %c0_32] : memref<8x128xf32, #tpu.memory_space<vmem>>, vector<8x128xf32>
    tpu.vector_store %arg3[%c0_31, %c0_32], %92 {strides = array<i32>} : memref<8x128xf32, #tpu.memory_space<vmem>>, vector<8x128xf32>,
    %94 = vector.extract_strided_slice %65 {offsets = [0, 255], sizes = [8, 1], strides = [1, 1]} : vector<8x256xf32> to vector<8x1xf32>
    %c0_33 = arith.constant 0 : index
    %c0_34 = arith.constant 0 : index
    %95 = vector.load %arg4[%c0_33, %c0_34] : memref<8x128xf32, #tpu.memory_space<vmem>>, vector<8x1xf32>
    tpu.vector_store %arg4[%c0_33, %c0_34], %94 {strides = array<i32>} : memref<8x128xf32, #tpu.memory_space<vmem>>, vector<8x1xf32>,
    %96 = vector.extract_strided_slice %78 {offsets = [0, 255], sizes = [8, 1], strides = [1, 1]} : vector<8x256xf32> to vector<8x1xf32>
    %c0_35 = arith.constant 0 : index
    %c0_36 = arith.constant 0 : index
    %97 = vector.load %arg5[%c0_35, %c0_36] : memref<8x128xf32, #tpu.memory_space<vmem>>, vector<8x1xf32>
    tpu.vector_store %arg5[%c0_35, %c0_36], %96 {strides = array<i32>} : memref<8x128xf32, #tpu.memory_space<vmem>>, vector<8x1xf32>,
    return
  }
  func.func @transform_0(%arg0: i32) -> (i32, i32) {
    %c0_i32 = arith.constant 0 : i32
    %c0_i32_0 = arith.constant 0 : i32
    %c0_i32_1 = arith.constant 0 : i32
    return %c0_i32, %c0_i32_0 : i32, i32
  }
  func.func @transform_1(%arg0: i32) -> (i32, i32) {
    %c0_i32 = arith.constant 0 : i32
    %c0_i32_0 = arith.constant 0 : i32
    return %c0_i32, %arg0 : i32, i32
  }
  func.func @transform_2(%arg0: i32) -> (i32, i32) {
    %c0_i32 = arith.constant 0 : i32
    %c0_i32_0 = arith.constant 0 : i32
    %c0_i32_1 = arith.constant 0 : i32
    return %c0_i32, %c0_i32_0 : i32, i32
  }
}

</mosaic_0001>

<bundles_post_ra>
// kernel: criterion_forward.2
= control target key start
LH: loop header
LB: loop body
LE: loop exit
PB: predicated region body
PF: predicated region fallthrough
CT: control target
= control target key end

     0   :  { %9 = vsyncpa [#allocation3], 0  ;;  %s365_s0 = inlined_call_operand.hbm [shape: f32[8,256], index: 0, kind: input, shape index: {}]   ;;  %s366_s1 = inlined_call_operand.hbm [shape: s32[1,256], index: 1, kind: input, shape index: {}]   ;;  %s367_s2 = inlined_call_operand.vmem [shape: s32[8,256], index: 2, kind: output, shape index: {0}]   ;;  %s368_s3 = inlined_call_operand.vmem [shape: f32[1,24,128], index: 3, kind: output, shape index: {1}]  }
   0x1   :  { %s16_s14 = sshll.u32 %s365_s0, 4  ;;  %s17_s14 = int_to_ptr.hbm [resolvable:$true] %s16_s14 }
   0x2   :  { %10 = vsyncpa [#allocation5], 0  ;;  %s249_s15 = smov [#allocation2]   ;;  %s27_s19 = sshll.u32 %s366_s1, 4  ;;  %s28_s19 = int_to_ptr.hbm [resolvable:$true] %s27_s19 }
   0x3   :  { %s18_s16 = sshll.u32 %s249_s15, 4  ;;  %s250_s20 = smov [#allocation4]   ;;  %s19_s16 = int_to_ptr.vmem [resolvable:$true] %s18_s16 }
   0x4   :  { %21 = dma.hbm_to_vmem [thread:$0]  %s17_s14, 256, %s19_s16, [#allocation3]  }
   0x5   :  { %s29_s21 = sshll.u32 %s250_s20, 4  ;;  %s30_s21 = int_to_ptr.vmem [resolvable:$true] %s29_s21 }
   0x6   :  { %32 = dma.hbm_to_vmem [thread:$0]  %s28_s19, 32, %s30_s21, [#allocation5]  }
   0x7   :  { %245 = dma.done.wait [#allocation3], 256  }
   0x8   :  { %246 = vsyncadd [#allocation3], 4294967040 }
   0x9   :  { %247 = dma.done.wait [#allocation5], 32  }
   0xa   :  { %248 = vsyncadd [#allocation5], 4294967264  ;;  %v41_v0 = vld [vmem:[#allocation2] sm:$0xff]  ;;  %v42_v1 = vld [vmem:[#allocation2 + $0x8] sm:$0xff]  ;;  %v44_v13 = vlaneseq  ;;  %v251_v16 = vmov 0   ;;  %v252_v35 = vmov 0.0  }
   0xb   :  { %v63_v2 = vrot.slane %v41_v0, 4  ;;  %v69_v3 = vrot.slane %v42_v1, 4  ;;  %v43_v8 = vld [vmem:[#allocation4] sm:$0x3] }
   0xc   :  { %vm50_vm0 = vcmp.ne.s32.totalorder %v43_v8, 0  ;;  %v45_v20 = vshrl.u32 %v44_v13, 7  ;;  %v46_v21 = vperm.slane %v43_v8, 0  ;;  %v47_v25 = vperm.slane %v43_v8, 1 }
   0xd   :  { %v64_v4 = vmax.f32 %v41_v0, %v63_v2  ;;  %v70_v5 = vmax.f32 %v42_v1, %v69_v3  ;;  %v51_v17 = vsel %vm50_vm0, 1, %v251_v16  ;;  %v180_v54 = vsel %vm50_vm0, 1.0, %v252_v35 }
   0xe   :  { %v52_v22 = vperm.slane %v51_v17, 0  ;;  %v53_v26 = vperm.slane %v51_v17, 1  ;;  %vm281_vm1 = vcmp.eq.s32.totalorder %v46_v21, %v45_v20  ;;  %vm289_vm3 = vcmp.eq.s32.totalorder %v47_v25, %v45_v20 }
   0xf   :  { %v65_v6 = vrot.slane %v64_v4, 2  ;;  %v71_v7 = vrot.slane %v70_v5, 2 }
  0x10   :  { %vm285_vm2 = vcmp.eq.s32.totalorder %v52_v22, 1  ;;  %vm293_vm4 = vcmp.eq.s32.totalorder %v53_v26, 1 }
  0x11   :  { %v66_v9 = vmax.f32 %v64_v4, %v65_v6  ;;  %v72_v10 = vmax.f32 %v70_v5, %v71_v7  ;;  %vm56_vm5 = vmand %vm281_vm1, %vm285_vm2  ;;  %v132_v6 = vperm.slane %v180_v54, 0  ;;  %v133_v7 = vperm.slane %v180_v54, 1 }
  0x12   :  { %vm57_vm6 = vmand %vm289_vm3, %vm293_vm4  ;;  %v316_v36 = vsel %vm56_vm5, 1.0, %v252_v35 }
  0x13   :  { %v67_v11 = vrot.slane %v66_v9, 1  ;;  %v73_v12 = vrot.slane %v72_v10, 1  ;;  %v323_v37 = vsel %vm57_vm6, 1.0, %v252_v35 }
  0x14   :  { %v146_v40 = vadd.f32 %v323_v37, %v316_v36 }
  0x15   :  { %v68_v14 = vmax.f32 %v66_v9, %v67_v11  ;;  %v74_v15 = vmax.f32 %v72_v10, %v73_v12 }
  0x16   :  { %147 = vadd.xlane.f32.xlu1 %v146_v40 }
  0x17   :  { %v75_v18 = vsub.f32 %v41_v0, %v68_v14  ;;  %v76_v19 = vsub.f32 %v42_v1, %v74_v15 }
  0x19   :  { %v77_v23 = vmul.f32 1.442695, %v75_v18  ;;  %v79_v24 = vmul.f32 1.442695, %v76_v19 }
  0x1b   :  { %185 = vpow2.f32 %v77_v23 }
  0x1c   :  { %187 = vpow2.f32 %v79_v24 }
  0x21   :  { %v301_v31 = vpop.eup %185 }
  0x22   :  { %v307_v32 = vpop.eup %187  ;;  %v81_v33 = vrot.slane %v301_v31, 4 }
  0x23   :  { %v87_v34 = vrot.slane %v307_v32, 4 }
  0x24   :  { %v82_v38 = vadd.f32 %v301_v31, %v81_v33 }
  0x25   :  { %v88_v39 = vadd.f32 %v307_v32, %v87_v34  ;;  %v59_v34 = vsel %vm57_vm6, 1, %v251_v16 }
  0x26   :  { %v83_v41 = vrot.slane %v82_v38, 2 }
  0x27   :  { %v89_v42 = vrot.slane %v88_v39, 2 }
  0x28   :  { %v84_v43 = vadd.f32 %v83_v41, %v82_v38 }
  0x29   :  { %v90_v44 = vadd.f32 %v89_v42, %v88_v39 }
  0x2a   :  { %v85_v45 = vrot.slane %v84_v43, 1 }
  0x2b   :  { %v91_v46 = vrot.slane %v90_v44, 1 }
  0x2c   :  { %v86_v47 = vadd.f32 %v85_v45, %v84_v43 }
  0x2d   :  { %v92_v48 = vadd.f32 %v91_v46, %v90_v44 }
  0x2e   :  { %189 = vlog2.f32 %v86_v47  ;;  %vm98_vm9 = vweird.f32 %v86_v47  ;;  %v104_v0 = vand.u32 2147483648, %v86_v47  ;;  %v102_v3 = vand.u32 2147483647, %v86_v47 }
  0x2f   :  { %191 = vrcp.f32 %v92_v48  ;;  %vm113_vm7 = vweird.f32 %v92_v48  ;;  %v119_v56 = vand.u32 2147483648, %v92_v48  ;;  %v117_v60 = vand.u32 2147483647, %v92_v48 }
  0x30   :  { %193 = vlog2.f32 %v92_v48  ;;  %v105_v11 = vor.u32 1.1754944e-38, %v104_v0  ;;  %vm103_vm14 = vcmp.eq.f32.partialorder %v102_v3, 8.507059e+37 }
  0x31   :  { %195 = vrcp.f32 %v86_v47  ;;  %v120_v4 = vor.u32 1.1754944e-38, %v119_v56  ;;  %vm118_vm12 = vcmp.eq.f32.partialorder %v117_v60, 8.507059e+37 }
  0x34   :  { %v190_v49 = vpop.eup %189 }
  0x35   :  { %v192_v50 = vpop.eup %191  ;;  %v124_v51 = vmul.f32 0.6931472, %v190_v49 }
  0x36   :  { %v194_v52 = vpop.eup %193  ;;  %v109_v53 = vmul.f32 %v192_v50, %v92_v48  ;;  %vm114_vm8 = vweird.f32 %v192_v50 }
  0x37   :  { %v196_v55 = vpop.eup %195  ;;  %v126_v57 = vmul.f32 0.6931472, %v194_v52  ;;  %v127_v58 = vsub.f32 %v124_v51, %v75_v18  ;;  %vm115_vm11 = vmor %vm113_vm7, %vm114_vm8 }
  0x38   :  { %v110_v59 = vsub.f32 1.0, %v109_v53  ;;  %v94_v61 = vmul.f32 %v196_v55, %v86_v47  ;;  %vm99_vm10 = vweird.f32 %v196_v55 }
  0x39   :  { %v128_v62 = vsub.f32 %v126_v57, %v76_v19  ;;  %v138_v63 = vmul.f32 %v316_v36, %v127_v58  ;;  %vm100_vm13 = vmor %vm98_vm9, %vm99_vm10  ;;  %v136_v15 = vmul.f32 %v132_v6, %v127_v58 }
  0x3a   :  { %v111_v1 = vmul.f32 %v192_v50, %v110_v59  ;;  %v95_v2 = vsub.f32 1.0, %v94_v61 }
  0x3b   :  { %v139_v5 = vmul.f32 %v323_v37, %v128_v62  ;;  %v137_v17 = vmul.f32 %v133_v7, %v128_v62 }
  0x3c   :  { %v112_v8 = vadd.f32 %v192_v50, %v111_v1  ;;  %v96_v9 = vmul.f32 %v196_v55, %v95_v2 }
  0x3d   :  { %v140_v10 = vadd.f32 %v139_v5, %v138_v63  ;;  %v143_v23 = vadd.f32 %v137_v17, %v136_v15 }
  0x3e   :  { %v116_v12 = vsel %vm115_vm11, %v192_v50, %v112_v8  ;;  %v97_v13 = vadd.f32 %v196_v55, %v96_v9 }
  0x3f   :  { %v121_v14 = vsel %vm118_vm12, %v120_v4, %v116_v12  ;;  %141 = vadd.xlane.f32.xlu0 %v140_v10 }
  0x40   :  { %v130_v18 = vmul.f32 %v307_v32, %v121_v14  ;;  %v101_v19 = vsel %vm100_vm13, %v196_v55, %v97_v13 }
  0x41   :  { %v106_v20 = vsel %vm103_vm14, %v105_v11, %v101_v19 }
  0x42   :  { %v150_v21 = vsub.f32 %v323_v37, %v130_v18  ;;  %v129_v22 = vmul.f32 %v301_v31, %v106_v20  ;;  %v58_v31 = vsel %vm56_vm5, 1, %v251_v16 }
  0x44   :  { %v152_v24 = vand.u32 2147483647, %v150_v21  ;;  %v149_v25 = vsub.f32 %v316_v36, %v129_v22 }
  0x46   :  { %v151_v26 = vand.u32 2147483647, %v149_v25  ;;  %v154_v33 = vmul.f32 %v152_v24, %v133_v7 }
  0x47   :  { %144 = vadd.xlane.f32.xlu0 %v143_v23 }
  0x48   :  { %v158_v32 = vand.u32 4294967294, %v154_v33  ;;  %v153_v35 = vmul.f32 %v151_v26, %v132_v6 }
  0x4a   :  { %v160_v36 = vor.u32 %v158_v32, %v59_v34  ;;  %v157_v37 = vand.u32 4294967294, %v153_v35 }
  0x4c   :  { %v162_v38 = vxor.u32 4294967295, %v160_v36  ;;  %v159_v39 = vor.u32 %v157_v37, %v58_v31 }
  0x4e   :  { %164 = vst [vmem:[%s367_s2 + $0x8] sm:$0xff] %v162_v38  ;;  %v161_v29 = vxor.u32 4294967295, %v159_v39 }
  0x50   :  { %163 = vst [vmem:[%s367_s2] sm:$0xff] %v161_v29 }
  0x89   :  { %v148_v30 = vpop.xlane.xlu1 %147 }
  0x8a   :  { %167 = vst [vmem:[%s368_s3 + $0x10] sm:$0xff] %v148_v30 }
  0xb2   :  { %v142_v27 = vpop.xlane.xlu0 %141 }
  0xb3   :  { %165 = vst [vmem:[%s368_s3] sm:$0xff] %v142_v27 }
  0xba   :  { %v145_v16 = vpop.xlane.xlu0 %144 }
  0xbb   :  { %166 = vst [vmem:[%s368_s3 + $0x8] sm:$0xff] %v145_v16 }
  0xbc   :  { %176 = vsyncpa [#allocation3], 1 }
  0xbd   :  { %177 = vsyncpa [#allocation5], 1 }

// kernel: criterion_forward.3
= control target key start
LH: loop header
LB: loop body
LE: loop exit
PB: predicated region body
PF: predicated region fallthrough
CT: control target
= control target key end

     0   :  { %s244_s13 = smov 1   ;;  %v33_v8 = vlaneseq  ;;  %s246_s14 = smov 4   ;;  %v250_v45 = vmov 0   ;;  %v251_v46 = vmov 0.0   ;;  %s332_s1 = inlined_call_operand.vmem [shape: s32[8,256], index: 1, kind: input, shape index: {}]   ;;  %s333_s0 = inlined_call_operand.vmem [shape: f32[8,1], index: 0, kind: input, shape index: {}]   ;;  %s334_s2 = inlined_call_operand.vmem [shape: f32[8,128], index: 2, kind: output, shape index: {}]  }
   0x1   :  { %v271_v0 = vld [vmem:[%s332_s1] sm:$0xff]  ;;  %v276_v1 = vld [vmem:[%s332_s1 + $0x8] sm:$0xff]  ;;  %s245_s1 = smov 2   ;;  %s247_s15 = smov 8   ;;  %238 = vset.pattern.permute.xlu0 %v250_v45  ;;  %237 = vset.pattern.permute.xlu2 %v250_v45 }
   0x2   :  { %v21_v2 = vxor.u32 4294967295, %v271_v0  ;;  %v22_v4 = vxor.u32 4294967295, %v276_v1  ;;  %v286_v10 = vand.u32 127, %v33_v8  ;;  %s248_s16 = smov 16   ;;  %s249_s17 = smov 32   ;;  %239 = vset.pattern.permute.xlu1 %v250_v45  ;;  %v13_v54 = vld [vmem:[%s333_s0] sm:$0xff] }
   0x3   :  { %s252_s18 = smov 64  }
   0x4   :  { %v23_v3 = vand.u32 1, %v21_v2  ;;  %v24_v6 = vand.u32 1, %v22_v4  ;;  %vm40_vm0 = vcmp.lt.s32.totalorder %v286_v10, 1  ;;  %vm43_vm1 = vcmp.ge.s32.totalorder %v286_v10, 1 }
   0x5   :  { %vm53_vm2 = vcmp.lt.s32.totalorder %v286_v10, 2  ;;  %vm56_vm3 = vcmp.ge.s32.totalorder %v286_v10, 2  ;;  %vm66_vm4 = vcmp.lt.s32.totalorder %v286_v10, 4  ;;  %vm69_vm5 = vcmp.ge.s32.totalorder %v286_v10, 4 }
   0x6   :  { %v25_v5 = vcvt.s32.f32 %v23_v3  ;;  %v26_v7 = vcvt.s32.f32 %v24_v6  ;;  %vm79_vm6 = vcmp.lt.s32.totalorder %v286_v10, 8  ;;  %vm82_vm7 = vcmp.ge.s32.totalorder %v286_v10, 8 }
   0x7   :  { %vm92_vm8 = vcmp.lt.s32.totalorder %v286_v10, 16  ;;  %vm95_vm9 = vcmp.ge.s32.totalorder %v286_v10, 16  ;;  %vm105_vm10 = vcmp.lt.s32.totalorder %v286_v10, 32  ;;  %vm108_vm11 = vcmp.ge.s32.totalorder %v286_v10, 32 }
   0x8   :  { %36 = vrot.lane.b32.xlu0 %v25_v5, %s244_s13  ;;  %v35_v55 = vadd.s32 128, %v286_v10  ;;  %vm118_vm12 = vcmp.lt.s32.totalorder %v286_v10, 64  ;;  %vm121_vm13 = vcmp.ge.s32.totalorder %v286_v10, 64  ;;  %v143_v57 = vadd.s32 1, %v286_v10 }
   0xa   :  { %v144_v61 = vadd.s32 1, %v35_v55  ;;  %v145_v6 = vcvt.s32.f32 %v143_v57 }
   0xc   :  { %v146_v8 = vcvt.s32.f32 %v144_v61 }
  0x10   :  { %38 = vrot.lane.b32.xlu0 %v26_v7, %s244_s13 }
  0x7a   :  { %v37_v9 = vpop.permute.xlu0 %36 }
  0x82   :  { %v39_v11 = vpop.permute.xlu0 %38 }
  0x83   :  { %v42_v12 = vsel %vm40_vm0, %v39_v11, %v37_v9  ;;  %v41_v15 = vsel %vm40_vm0, %v37_v9, %v39_v11 }
  0x84   :  { %v45_v13 = vsel %vm43_vm1, %v42_v12, 0.0  ;;  %v48_v16 = vadd.f32 %v41_v15, %v26_v7 }
  0x85   :  { %v47_v14 = vadd.f32 %v45_v13, %v25_v5 }
  0x87   :  { %49 = vrot.lane.b32.xlu1 %v47_v14, %s245_s1 }
  0x8f   :  { %51 = vrot.lane.b32.xlu1 %v48_v16, %s245_s1 }
  0xf9   :  { %v50_v17 = vpop.permute.xlu1 %49 }
 0x101   :  { %v52_v18 = vpop.permute.xlu1 %51 }
 0x102   :  { %v55_v19 = vsel %vm53_vm2, %v52_v18, %v50_v17  ;;  %v54_v22 = vsel %vm53_vm2, %v50_v17, %v52_v18 }
 0x103   :  { %v58_v20 = vsel %vm56_vm3, %v55_v19, 0.0  ;;  %v61_v23 = vadd.f32 %v54_v22, %v48_v16 }
 0x104   :  { %v60_v21 = vadd.f32 %v58_v20, %v47_v14 }
 0x106   :  { %62 = vrot.lane.b32.xlu2 %v60_v21, %s246_s14 }
 0x10e   :  { %64 = vrot.lane.b32.xlu2 %v61_v23, %s246_s14 }
 0x160   :  { %v63_v24 = vpop.permute.xlu2 %62 }
 0x168   :  { %v65_v25 = vpop.permute.xlu2 %64 }
 0x169   :  { %v67_v26 = vsel %vm66_vm4, %v63_v24, %v65_v25  ;;  %v68_v27 = vsel %vm66_vm4, %v65_v25, %v63_v24 }
 0x16a   :  { %v71_v28 = vsel %vm69_vm5, %v68_v27, 0.0  ;;  %v74_v29 = vadd.f32 %v67_v26, %v61_v23 }
 0x16b   :  { %v73_v30 = vadd.f32 %v71_v28, %v60_v21 }
 0x16c   :  { %77 = vrot.lane.b32.xlu1 %v74_v29, %s247_s15 }
 0x16d   :  { %75 = vrot.lane.b32.xlu0 %v73_v30, %s247_s15 }
 0x1de   :  { %v78_v31 = vpop.permute.xlu1 %77 }
 0x1df   :  { %v76_v32 = vpop.permute.xlu0 %75 }
 0x1e0   :  { %v80_v33 = vsel %vm79_vm6, %v76_v32, %v78_v31  ;;  %v81_v34 = vsel %vm79_vm6, %v78_v31, %v76_v32 }
 0x1e1   :  { %v84_v35 = vsel %vm82_vm7, %v81_v34, 0.0  ;;  %v87_v36 = vadd.f32 %v80_v33, %v74_v29 }
 0x1e2   :  { %v86_v37 = vadd.f32 %v84_v35, %v73_v30 }
 0x1e3   :  { %90 = vrot.lane.b32.xlu0 %v87_v36, %s248_s16 }
 0x1e4   :  { %88 = vrot.lane.b32.xlu2 %v86_v37, %s248_s16 }
 0x23e   :  { %v89_v38 = vpop.permute.xlu2 %88 }
 0x255   :  { %v91_v39 = vpop.permute.xlu0 %90 }
 0x256   :  { %v93_v40 = vsel %vm92_vm8, %v89_v38, %v91_v39  ;;  %v94_v41 = vsel %vm92_vm8, %v91_v39, %v89_v38 }
 0x257   :  { %v97_v42 = vsel %vm95_vm9, %v94_v41, 0.0  ;;  %v100_v43 = vadd.f32 %v93_v40, %v87_v36 }
 0x258   :  { %v99_v44 = vadd.f32 %v97_v42, %v86_v37 }
 0x259   :  { %103 = vrot.lane.b32.xlu2 %v100_v43, %s249_s17 }
 0x25a   :  { %101 = vrot.lane.b32.xlu1 %v99_v44, %s249_s17 }
 0x261   :  { %135 = vperm.xlu2 %237, %v251_v46  }
 0x2b3   :  { %v104_v47 = vpop.permute.xlu2 %103 }
 0x2bb   :  { %v136_v3 = vpop.permute.xlu2 %135 }
 0x2cc   :  { %v102_v48 = vpop.permute.xlu1 %101 }
 0x2cd   :  { %v106_v49 = vsel %vm105_vm10, %v102_v48, %v104_v47  ;;  %v107_v50 = vsel %vm105_vm10, %v104_v47, %v102_v48 }
 0x2ce   :  { %v110_v51 = vsel %vm108_vm11, %v107_v50, 0.0  ;;  %v113_v52 = vadd.f32 %v106_v49, %v100_v43 }
 0x2cf   :  { %v112_v53 = vadd.f32 %v110_v51, %v99_v44  ;;  %v27_v51 = vand.u32 4294967294, %v21_v2 }
 0x2d0   :  { %116 = vrot.lane.b32.xlu1 %v113_v52, %s252_s18 }
 0x2d1   :  { %114 = vrot.lane.b32.xlu0 %v112_v53, %s252_s18 }
 0x2d9   :  { %151 = vperm.xlu0 %238, %v13_v54  }
 0x342   :  { %v117_v56 = vpop.permute.xlu1 %116 }
 0x343   :  { %v115_v58 = vpop.permute.xlu0 %114 }
 0x344   :  { %v119_v59 = vsel %vm118_vm12, %v115_v58, %v117_v56  ;;  %v120_v60 = vsel %vm118_vm12, %v117_v56, %v115_v58 }
 0x345   :  { %v123_v62 = vsel %vm121_vm13, %v120_v60, 0.0  ;;  %v126_v63 = vadd.f32 %v119_v59, %v113_v52  ;;  %v28_v52 = vand.u32 4294967294, %v22_v4 }
 0x346   :  { %v125_v5 = vadd.f32 %v123_v62, %v112_v53 }
 0x348   :  { %v132_v7 = vadd.f32 %v126_v63, %v125_v5  ;;  %v138_v9 = vadd.f32 %v136_v3, %v125_v5 }
 0x34a   :  { %v139_v11 = vadd.f32 %v136_v3, %v132_v7  ;;  %v147_v12 = vsub.f32 %v145_v6, %v138_v9 }
 0x34b   :  { %v152_v13 = vpop.permute.xlu0 %151 }
 0x34c   :  { %v148_v14 = vsub.f32 %v146_v8, %v139_v11  ;;  %v156_v15 = vadd.f32 %v152_v13, %v147_v12  ;;  %214 = vrot.lane.b32.xlu0 %v139_v11, %s244_s13  ;;  %v154_v30 = vsub.f32 %v152_v13, %v138_v9  ;;  %v155_v36 = vsub.f32 %v152_v13, %v139_v11 }
 0x34e   :  { %v157_v16 = vadd.f32 %v152_v13, %v148_v14  ;;  %240 = vrcp.f32 %v156_v15  ;;  %v169_v22 = vand.u32 2147483648, %v156_v15  ;;  %v167_v24 = vand.u32 2147483647, %v156_v15 }
 0x34f   :  { %vm163_vm15 = vweird.f32 %v156_v15 }
 0x350   :  { %242 = vrcp.f32 %v157_v16  ;;  %v184_v26 = vand.u32 2147483648, %v157_v16  ;;  %v182_v29 = vand.u32 2147483647, %v157_v16  ;;  %v170_v31 = vor.u32 1.1754944e-38, %v169_v22 }
 0x351   :  { %vm168_vm4 = vcmp.eq.f32.partialorder %v167_v24, 8.507059e+37  ;;  %vm178_vm5 = vweird.f32 %v157_v16 }
 0x352   :  { %v185_v35 = vor.u32 1.1754944e-38, %v184_v26  ;;  %vm183_vm7 = vcmp.eq.f32.partialorder %v182_v29, 8.507059e+37 }
 0x354   :  { %v241_v17 = vpop.eup %240 }
 0x355   :  { %v159_v18 = vmul.f32 %v241_v17, %v156_v15  ;;  %vm164_vm14 = vweird.f32 %v241_v17 }
 0x356   :  { %v243_v19 = vpop.eup %242  ;;  %vm165_vm3 = vmor %vm163_vm15, %vm164_vm14 }
 0x357   :  { %v160_v20 = vsub.f32 1.0, %v159_v18  ;;  %v174_v21 = vmul.f32 %v243_v19, %v157_v16  ;;  %vm179_vm2 = vweird.f32 %v243_v19 }
 0x358   :  { %vm180_vm6 = vmor %vm178_vm5, %vm179_vm2 }
 0x359   :  { %v161_v23 = vmul.f32 %v241_v17, %v160_v20  ;;  %v175_v25 = vsub.f32 1.0, %v174_v21 }
 0x35b   :  { %v162_v27 = vadd.f32 %v241_v17, %v161_v23  ;;  %v176_v28 = vmul.f32 %v243_v19, %v175_v25 }
 0x35d   :  { %v166_v32 = vsel %vm165_vm3, %v241_v17, %v162_v27  ;;  %v177_v33 = vadd.f32 %v243_v19, %v176_v28 }
 0x35e   :  { %v171_v34 = vsel %vm168_vm4, %v170_v31, %v166_v32 }
 0x35f   :  { %v172_v37 = vmul.f32 %v171_v34, %v154_v30  ;;  %v181_v38 = vsel %vm180_vm6, %v243_v19, %v177_v33 }
 0x360   :  { %v186_v39 = vsel %vm183_vm7, %v185_v35, %v181_v38 }
 0x361   :  { %v188_v40 = vsub.f32 1.0, %v172_v37  ;;  %v187_v41 = vmul.f32 %v186_v39, %v155_v36 }
 0x363   :  { %190 = vrot.lane.b32.xlu1 %v188_v40, %s244_s13  ;;  %v189_v42 = vsub.f32 1.0, %v187_v41 }
 0x365   :  { %192 = vrot.lane.b32.xlu2 %v189_v42, %s244_s13 }
 0x36b   :  { %198 = vperm.xlu1 %239, %v251_v46  }
 0x373   :  { %220 = vrot.lane.b32.xlu1 %v189_v42, %s244_s13 }
 0x3be   :  { %v215_v43 = vpop.permute.xlu0 %214 }
 0x3bf   :  { %v193_v45 = vpop.permute.xlu2 %192 }
 0x3d5   :  { %v191_v44 = vpop.permute.xlu1 %190 }
 0x3d6   :  { %v194_v47 = vsel %vm40_vm0, %v191_v44, %v193_v45  ;;  %v195_v48 = vsel %vm40_vm0, %v193_v45, %v191_v44 }
 0x3d7   :  { %v204_v49 = vsub.f32 %v189_v42, %v194_v47 }
 0x3d9   :  { %v206_v55 = vmul.f32 %v204_v49, %v28_v52 }
 0x3dd   :  { %v199_v50 = vpop.permute.xlu1 %198 }
 0x3de   :  { %v201_v46 = vsel %vm43_vm1, %v195_v48, %v199_v50 }
 0x3df   :  { %v203_v53 = vsub.f32 %v188_v40, %v201_v46 }
 0x3e1   :  { %v205_v54 = vmul.f32 %v203_v53, %v27_v51 }
 0x3e3   :  { %v207_v56 = vadd.f32 %v206_v55, %v205_v54 }
 0x3e5   :  { %208 = vadd.xlane.f32.xlu2 %v207_v56  ;;  %v221_v57 = vpop.permute.xlu1 %220 }
 0x458   :  { %v209_v58 = vpop.xlane.xlu2 %208 }
 0x459   :  { %212 = vst [vmem:[%s334_s2] sm:$0xff] %v209_v58 }

</bundles_post_ra>
